<compile_context>
chip_gen: v7x
topology: tpu7x:2x2x1
jax: 0.10.0
libtpu: 0.0.40
codegen_flags: <defaults>
</compile_context>

<pallas_src>
import functools

import jax
import jax.numpy as jnp
from jax.experimental import pallas as pl
from jax.experimental.pallas import tpu as pltpu


def mdn2d_kernel(x_ref, w_ref, b_ref, sigma_ref, mu_ref, pi_ref, *,
                 num_gaussians, out_x_gauss, in_features):
    """One pixel tile: fused 1x1 conv for all heads + exp / softmax."""
    G, OG, C = num_gaussians, out_x_gauss, in_features

    x = x_ref[0].astype(jnp.float32)       # (C, tile_n)   lanes = pixels
    w = w_ref[...]                         # (K_total, C)  fused [sigma; mu; pi]
    b = b_ref[...]                         # (K_total, 1)
    tile_n = x.shape[-1]
    k_total = w.shape[0]

    if C <= 8:
        # Tiny contraction depth: an unrolled broadcast-FMA on the VPU beats a
        # >95%-padded MXU matmul and avoids the result-FIFO pop latency.
        # (Static C -> fully unrolled at trace time.)
        y = jnp.broadcast_to(b, (k_total, tile_n))
        for c in range(C):
            y = y + w[:, c:c + 1] * x[c:c + 1, :]
    else:
        y = jnp.dot(w, x, preferred_element_type=jnp.float32) + b

    # Fused-output row layout: [sigma(OG) | mu(OG) | pi(G)] -> the sigma/mu
    # slices are sublane(8)-aligned whenever OG is a multiple of 8.
    sigma_ref[0] = jnp.exp(y[:OG]).astype(sigma_ref.dtype)
    mu_ref[0] = y[OG:2 * OG].astype(mu_ref.dtype)

    # pi head: numerically-stable softmax over the gaussian (sublane) axis.
    logits = y[2 * OG:2 * OG + G]
    m = jnp.max(logits, axis=0, keepdims=True)          # XLU cross-sublane
    e = jnp.exp(logits - m)                              # EUP
    denom = jnp.sum(e, axis=0, keepdims=True)
    pi_ref[0] = (e * pl.reciprocal(denom, approx=True)).astype(pi_ref.dtype)


def mdn2d_forward(x_nchw, params, *, tile_n=2048):
    """x_nchw: (B, C, H, W) float32.  Returns NCHW outputs:
       pi: (B, G, H, W), sigma: (B, O*G, H, W), mu: (B, O*G, H, W)."""
    w_pi, b_pi, w_sig, b_sig, w_mu, b_mu = params      # weights are (K, C)
    B, C, H, W = x_nchw.shape
    G = w_pi.shape[0]
    OG = w_sig.shape[0]
    k_total = G + 2 * OG
    HW = H * W

    # Channels-first flatten: pure reshape, no transpose, no extra HBM pass.
    x_flat = x_nchw.reshape(B, C, HW)

    # Fuse the three heads into one weight matrix / bias column.
    # Row order [sigma; mu; pi] keeps the in-kernel slices sublane-aligned.
    w_all = jnp.concatenate([w_sig, w_mu, w_pi], axis=0)            # (K_total, C)
    b_all = jnp.concatenate([b_sig, b_mu, b_pi], axis=0).reshape(k_total, 1)

    # Pixel-axis tile: full extent when small, otherwise a multiple of 128
    # with a cdiv grid (Pallas masks the tail block — no divisibility
    # requirement on H*W).  Per-step VMEM ≈ 2 bufs * (C + 2*K_total) * tile_n
    # * 4B, comfortably inside the scoped limit at tile_n = 2048.
    if HW <= tile_n or tile_n < 128:
        tile_n = HW
    else:
        tile_n = (tile_n // 128) * 128
    grid = (B, pl.cdiv(HW, tile_n))

    kernel = functools.partial(mdn2d_kernel, num_gaussians=G,
                               out_x_gauss=OG, in_features=C)

    def pix_spec(k):
        # (batch, channel-rows, pixel-lanes); last dim lane-dense.
        return pl.BlockSpec((1, k, tile_n), lambda b, i: (b, 0, i))

    def resident_spec(shape):
        # Constant index_map -> the block stays resident in VMEM across steps.
        return pl.BlockSpec(shape, lambda b, i: (0, 0))

    sigma_f, mu_f, pi_f = pl.pallas_call(
        kernel,
        out_shape=(
            jax.ShapeDtypeStruct((B, OG, HW), jnp.float32),   # sigma
            jax.ShapeDtypeStruct((B, OG, HW), jnp.float32),   # mu
            jax.ShapeDtypeStruct((B, G, HW), jnp.float32),    # pi
        ),
        grid_spec=pltpu.PrefetchScalarGridSpec(
            num_scalar_prefetch=0,
            grid=grid,
            in_specs=[
                pix_spec(C),                       # x tile (1, C, tile_n)
                resident_spec((k_total, C)),       # fused weights
                resident_spec((k_total, 1)),       # fused bias
            ],
            out_specs=[
                pix_spec(OG),                      # sigma
                pix_spec(OG),                      # mu
                pix_spec(G),                       # pi
            ],
        ),
        compiler_params=pltpu.CompilerParams(
            dimension_semantics=("parallel", "parallel")),
    )(x_flat, w_all, b_all)

    # (B, K, H*W) -> (B, K, H, W): pure reshape, matches PyTorch NCHW outputs.
    return (pi_f.reshape(B, G, H, W),
            sigma_f.reshape(B, OG, H, W),
            mu_f.reshape(B, OG, H, W))


def init_params(key, in_features, out_features, num_gaussians):
    """Deterministic synthetic init; weight layout (out_ch, in_ch) matches
    nn.Conv2d(in, out, 1).weight[..., 0, 0]."""
    G, O, C = num_gaussians, out_features, in_features
    ks = jax.random.split(key, 6)
    scale = 1.0 / jnp.sqrt(C)
    w_pi = jax.random.uniform(ks[0], (G, C), jnp.float32, -scale, scale)
    b_pi = jax.random.uniform(ks[1], (G,), jnp.float32, -scale, scale)
    w_sig = jax.random.uniform(ks[2], (O * G, C), jnp.float32, -scale, scale)
    b_sig = jax.random.uniform(ks[3], (O * G,), jnp.float32, -scale, scale)
    w_mu = jax.random.uniform(ks[4], (O * G, C), jnp.float32, -scale, scale)
    b_mu = jax.random.uniform(ks[5], (O * G,), jnp.float32, -scale, scale)
    return (w_pi, b_pi, w_sig, b_sig, w_mu, b_mu)


def _reference(x_nchw, params):
    """Pure-JAX reference of the PyTorch forward (sanity check)."""
    w_pi, b_pi, w_sig, b_sig, w_mu, b_mu = params
    B, C, H, W = x_nchw.shape
    G, OG = w_pi.shape[0], w_sig.shape[0]
    x = x_nchw.reshape(B, C, H * W)
    logits = jnp.einsum("kc,bcn->bkn", w_pi, x) + b_pi[None, :, None]
    pi = jax.nn.softmax(logits, axis=1)
    sigma = jnp.exp(jnp.einsum("kc,bcn->bkn", w_sig, x) + b_sig[None, :, None])
    mu = jnp.einsum("kc,bcn->bkn", w_mu, x) + b_mu[None, :, None]
    return (pi.reshape(B, G, H, W), sigma.reshape(B, OG, H, W),
            mu.reshape(B, OG, H, W))


if __name__ == "__main__":
    B, C, H, W = 2, 4, 16, 16          # in_features = 4
    O, G = 4, 4                         # out_features = 4, num_gaussians = 4

    key = jax.random.PRNGKey(0)
    kx, kp = jax.random.split(key)
    x = jax.random.normal(kx, (B, C, H, W), jnp.float32)
    params = init_params(kp, C, O, G)

    fwd = jax.jit(mdn2d_forward)
    pi, sigma, mu = jax.block_until_ready(fwd(x, params))

    # Sanity check against the pure-JAX reference.
    pi_r, sigma_r, mu_r = _reference(x, params)
    assert pi.shape == (B, G, H, W)
    assert sigma.shape == (B, O * G, H, W)
    assert mu.shape == (B, O * G, H, W)
    # pi uses the EUP approximate reciprocal -> slightly looser tolerance.
    assert jnp.allclose(pi, pi_r, atol=2e-3, rtol=2e-3)
    assert jnp.allclose(sigma, sigma_r, atol=1e-4, rtol=1e-5)
    assert jnp.allclose(mu, mu_r, atol=1e-5, rtol=1e-5)

    print("KERNEL_OK")
</pallas_src>

<mosaic_0001>
module attributes {stable_mosaic.version = 11 : i64} {
  func.func @mdn2d_kernel(%arg0: i32, %arg1: i32, %arg2: memref<1x4x256xf32, #tpu.memory_space<vmem>>, %arg3: memref<36x4xf32, #tpu.memory_space<vmem>>, %arg4: memref<36x1xf32, #tpu.memory_space<vmem>>, %arg5: memref<1x16x256xf32, #tpu.memory_space<vmem>>, %arg6: memref<1x16x256xf32, #tpu.memory_space<vmem>>, %arg7: memref<1x4x256xf32, #tpu.memory_space<vmem>>) attributes {dimension_semantics = [#tpu.dimension_semantics<parallel>, #tpu.dimension_semantics<parallel>], iteration_bounds = array<i64: 2, 1>, scalar_prefetch = 0 : i64, scratch_operands = 0 : i64, tpu.core_type = #tpu.core_type<tc>, window_params = [{transform_indices = @transform_0, window_bounds = array<i64: 1, 4, 256>}, {pipeline_mode = #tpu.pipeline_mode<synchronous>, transform_indices = @transform_1, window_bounds = array<i64: 36, 4>}, {pipeline_mode = #tpu.pipeline_mode<synchronous>, transform_indices = @transform_2, window_bounds = array<i64: 36, 1>}, {transform_indices = @transform_3, window_bounds = array<i64: 1, 16, 256>}, {transform_indices = @transform_4, window_bounds = array<i64: 1, 16, 256>}, {transform_indices = @transform_5, window_bounds = array<i64: 1, 4, 256>}]} {
    %c0 = arith.constant 0 : index
    %c0_0 = arith.constant 0 : index
    %c0_1 = arith.constant 0 : index
    %0 = vector.load %arg2[%c0, %c0_0, %c0_1] : memref<1x4x256xf32, #tpu.memory_space<vmem>>, vector<1x4x256xf32>
    %1 = vector.shape_cast %0 : vector<1x4x256xf32> to vector<4x256xf32>
    %c0_2 = arith.constant 0 : index
    %c0_3 = arith.constant 0 : index
    %2 = vector.load %arg3[%c0_2, %c0_3] : memref<36x4xf32, #tpu.memory_space<vmem>>, vector<36x4xf32>
    %c0_4 = arith.constant 0 : index
    %c0_5 = arith.constant 0 : index
    %3 = vector.load %arg4[%c0_4, %c0_5] : memref<36x1xf32, #tpu.memory_space<vmem>>, vector<36x1xf32>
    %4 = vector.shape_cast %3 : vector<36x1xf32> to vector<36x1xf32>
    %5 = vector.broadcast %4 : vector<36x1xf32> to vector<36x256xf32>
    %6 = vector.extract_strided_slice %2 {offsets = [0, 0], sizes = [36, 1], strides = [1, 1]} : vector<36x4xf32> to vector<36x1xf32>
    %7 = vector.extract_strided_slice %1 {offsets = [0, 0], sizes = [1, 256], strides = [1, 1]} : vector<4x256xf32> to vector<1x256xf32>
    %8 = vector.broadcast %6 : vector<36x1xf32> to vector<36x256xf32>
    %9 = vector.broadcast %7 : vector<1x256xf32> to vector<36x256xf32>
    %10 = arith.mulf %8, %9 : vector<36x256xf32>
    %11 = arith.addf %5, %10 : vector<36x256xf32>
    %12 = vector.extract_strided_slice %2 {offsets = [0, 1], sizes = [36, 1], strides = [1, 1]} : vector<36x4xf32> to vector<36x1xf32>
    %13 = vector.extract_strided_slice %1 {offsets = [1, 0], sizes = [1, 256], strides = [1, 1]} : vector<4x256xf32> to vector<1x256xf32>
    %14 = vector.broadcast %12 : vector<36x1xf32> to vector<36x256xf32>
    %15 = vector.broadcast %13 : vector<1x256xf32> to vector<36x256xf32>
    %16 = arith.mulf %14, %15 : vector<36x256xf32>
    %17 = arith.addf %11, %16 : vector<36x256xf32>
    %18 = vector.extract_strided_slice %2 {offsets = [0, 2], sizes = [36, 1], strides = [1, 1]} : vector<36x4xf32> to vector<36x1xf32>
    %19 = vector.extract_strided_slice %1 {offsets = [2, 0], sizes = [1, 256], strides = [1, 1]} : vector<4x256xf32> to vector<1x256xf32>
    %20 = vector.broadcast %18 : vector<36x1xf32> to vector<36x256xf32>
    %21 = vector.broadcast %19 : vector<1x256xf32> to vector<36x256xf32>
    %22 = arith.mulf %20, %21 : vector<36x256xf32>
    %23 = arith.addf %17, %22 : vector<36x256xf32>
    %24 = vector.extract_strided_slice %2 {offsets = [0, 3], sizes = [36, 1], strides = [1, 1]} : vector<36x4xf32> to vector<36x1xf32>
    %25 = vector.extract_strided_slice %1 {offsets = [3, 0], sizes = [1, 256], strides = [1, 1]} : vector<4x256xf32> to vector<1x256xf32>
    %26 = vector.broadcast %24 : vector<36x1xf32> to vector<36x256xf32>
    %27 = vector.broadcast %25 : vector<1x256xf32> to vector<36x256xf32>
    %28 = arith.mulf %26, %27 : vector<36x256xf32>
    %29 = arith.addf %23, %28 : vector<36x256xf32>
    %30 = vector.extract_strided_slice %29 {offsets = [0, 0], sizes = [16, 256], strides = [1, 1]} : vector<36x256xf32> to vector<16x256xf32>
    %31 = math.exp %30 : vector<16x256xf32>
    %c0_6 = arith.constant 0 : index
    %c0_7 = arith.constant 0 : index
    %c0_8 = arith.constant 0 : index
    %32 = vector.load %arg5[%c0_6, %c0_7, %c0_8] : memref<1x16x256xf32, #tpu.memory_space<vmem>>, vector<1x16x256xf32>
    %33 = vector.shape_cast %32 : vector<1x16x256xf32> to vector<16x256xf32>
    %34 = vector.shape_cast %31 : vector<16x256xf32> to vector<1x16x256xf32>
    tpu.vector_store %arg5[%c0_6, %c0_7, %c0_8], %34 {strides = array<i32>} : memref<1x16x256xf32, #tpu.memory_space<vmem>>, vector<1x16x256xf32>,
    %35 = vector.extract_strided_slice %29 {offsets = [16, 0], sizes = [16, 256], strides = [1, 1]} : vector<36x256xf32> to vector<16x256xf32>
    %c0_9 = arith.constant 0 : index
    %c0_10 = arith.constant 0 : index
    %c0_11 = arith.constant 0 : index
    %36 = vector.load %arg6[%c0_9, %c0_10, %c0_11] : memref<1x16x256xf32, #tpu.memory_space<vmem>>, vector<1x16x256xf32>
    %37 = vector.shape_cast %36 : vector<1x16x256xf32> to vector<16x256xf32>
    %38 = vector.shape_cast %35 : vector<16x256xf32> to vector<1x16x256xf32>
    tpu.vector_store %arg6[%c0_9, %c0_10, %c0_11], %38 {strides = array<i32>} : memref<1x16x256xf32, #tpu.memory_space<vmem>>, vector<1x16x256xf32>,
    %39 = vector.extract_strided_slice %29 {offsets = [32, 0], sizes = [4, 256], strides = [1, 1]} : vector<36x256xf32> to vector<4x256xf32>
    %cst = arith.constant dense<0xFF800000> : vector<256xf32>
    %40 = vector.multi_reduction <maximumf>, %39, %cst [0] : vector<4x256xf32> to vector<256xf32>
    %41 = vector.shape_cast %40 : vector<256xf32> to vector<1x256xf32>
    %42 = vector.broadcast %41 : vector<1x256xf32> to vector<4x256xf32>
    %43 = arith.subf %39, %42 : vector<4x256xf32>
    %44 = math.exp %43 : vector<4x256xf32>
    %cst_12 = arith.constant dense<0.000000e+00> : vector<256xf32>
    %45 = vector.multi_reduction <add>, %44, %cst_12 [0] : vector<4x256xf32> to vector<256xf32>
    %46 = vector.shape_cast %45 : vector<256xf32> to vector<1x256xf32>
    %47 = tpu.reciprocal %46 {approx = true} : vector<1x256xf32> -> vector<1x256xf32>
    %48 = vector.broadcast %47 : vector<1x256xf32> to vector<4x256xf32>
    %49 = arith.mulf %44, %48 : vector<4x256xf32>
    %c0_13 = arith.constant 0 : index
    %c0_14 = arith.constant 0 : index
    %c0_15 = arith.constant 0 : index
    %50 = vector.load %arg7[%c0_13, %c0_14, %c0_15] : memref<1x4x256xf32, #tpu.memory_space<vmem>>, vector<1x4x256xf32>
    %51 = vector.shape_cast %50 : vector<1x4x256xf32> to vector<4x256xf32>
    %52 = vector.shape_cast %49 : vector<4x256xf32> to vector<1x4x256xf32>
    tpu.vector_store %arg7[%c0_13, %c0_14, %c0_15], %52 {strides = array<i32>} : memref<1x4x256xf32, #tpu.memory_space<vmem>>, vector<1x4x256xf32>,
    return
  }
  func.func @transform_0(%arg0: i32, %arg1: i32) -> (i32, i32, i32) {
    %c0_i32 = arith.constant 0 : i32
    %c0_i32_0 = arith.constant 0 : i32
    return %arg0, %c0_i32, %arg1 : i32, i32, i32
  }
  func.func @transform_1(%arg0: i32, %arg1: i32) -> (i32, i32) {
    %c0_i32 = arith.constant 0 : i32
    %c0_i32_0 = arith.constant 0 : i32
    %c0_i32_1 = arith.constant 0 : i32
    return %c0_i32, %c0_i32_0 : i32, i32
  }
  func.func @transform_2(%arg0: i32, %arg1: i32) -> (i32, i32) {
    %c0_i32 = arith.constant 0 : i32
    %c0_i32_0 = arith.constant 0 : i32
    %c0_i32_1 = arith.constant 0 : i32
    return %c0_i32, %c0_i32_0 : i32, i32
  }
  func.func @transform_3(%arg0: i32, %arg1: i32) -> (i32, i32, i32) {
    %c0_i32 = arith.constant 0 : i32
    %c0_i32_0 = arith.constant 0 : i32
    return %arg0, %c0_i32, %arg1 : i32, i32, i32
  }
  func.func @transform_4(%arg0: i32, %arg1: i32) -> (i32, i32, i32) {
    %c0_i32 = arith.constant 0 : i32
    %c0_i32_0 = arith.constant 0 : i32
    return %arg0, %c0_i32, %arg1 : i32, i32, i32
  }
  func.func @transform_5(%arg0: i32, %arg1: i32) -> (i32, i32, i32) {
    %c0_i32 = arith.constant 0 : i32
    %c0_i32_0 = arith.constant 0 : i32
    return %arg0, %c0_i32, %arg1 : i32, i32, i32
  }
}

</mosaic_0001>

<bundles_post_ra>
// kernel: mdn2d_forward.1
= control target key start
LH: loop header
LB: loop body
LE: loop exit
PB: predicated region body
PF: predicated region fallthrough
CT: control target
= control target key end

     0   :  { %s971_s18 = smov 0   ;;  %s973_s19 = smov 0   ;;  %s1124_s0 = inlined_call_operand.vmem [shape: f32[2,4,256], index: 0, kind: input, shape index: {}]   ;;  %s1125_s1 = inlined_call_operand.vmem [shape: f32[36,4], index: 1, kind: input, shape index: {}]   ;;  %s1126_s2 = inlined_call_operand.vmem [shape: f32[36,1], index: 2, kind: input, shape index: {}]   ;;  %s1127_s3 = inlined_call_operand.vmem [shape: f32[2,16,256], index: 3, kind: output, shape index: {0}]   ;;  %s1128_s4 = inlined_call_operand.vmem [shape: f32[2,16,256], index: 4, kind: output, shape index: {1}]   ;;  %s1129_s5 = inlined_call_operand.vmem [shape: f32[2,4,256], index: 5, kind: output, shape index: {2}]  }
   0x1   :  { %s975_s20 = smov 0  }
   0x2 LB: > { %s28_s21 = sadd.s32 1, %s931_s19  ;;  %p836_p0 = scmp.ge.s32.totalorder %s935_s20, 1  ;;  %s935_s20 = sphi %s975_s20, %s16_s20   ;;  %s931_s19 = sphi %s973_s19, %s1131_s19   ;;  %s927_s18 = sphi %s971_s18, %s1130_s18  }
   0x3   : > { %p30_p1 = scmp.ge.s32.totalorder %s28_s21, 2  ;;  %p217_p2 = scmp.lt.s32.totalorder %s935_s20, 3 }
   0x5   : > { %s1133_s21 = smov (%p30_p1, %s28_s21), 0  ;;  %p218_p3 = pnand %p836_p0, %p217_p2 }
   0x6   : > { %v316_v0 = vld [vmem:[%s1125_s1 + $0x20] sm:$0xf] (!%p218_p3)  ;;  %v937_v1 = vmov (!%p218_p3), 1   ;;  %v938_v2 = vmov (!%p218_p3), 0   ;;  %v939_v4 = vmov (!%p218_p3), 2   ;;  %v940_v6 = vmov (!%p218_p3), 3  }
   0x7   : > { %221 = sbr.rel (%p218_p3) target bundleno = 210 (0xd2), region = 32  ;;  %880 = vset.pattern.permute.xlu1 (!%p218_p3), %v937_v1  ;;  %879 = vset.pattern.permute.xlu0 (!%p218_p3), %v938_v2  ;;  %v321_v3 = vld [vmem:[%s1126_s2 + $0x20] sm:$0xf] (!%p218_p3)  ;;  %v313_v7 = vld [vmem:[%s1125_s1 + $0x8] sm:$0xff] (!%p218_p3)  ;;  %v315_v10 = vld [vmem:[%s1125_s1 + $0x18] sm:$0xff] (!%p218_p3)  ;;  %p272_p4 = scmp.lt.s32.totalorder (!%p218_p3), %s927_s18, 1  ;;  %v373_v14 = vlaneseq (!%p218_p3) }
   0x8   : > { %428 = vperm.xlu1 (!%p218_p3), %880, %v316_v0   ;;  %369 = vperm.xlu0 (!%p218_p3), %879, %v316_v0   ;;  %v312_v5 = vld [vmem:[%s1125_s1] sm:$0xff] (!%p218_p3)  ;;  %v318_v8 = vld [vmem:[%s1126_s2 + $0x8] sm:$0xff] (!%p218_p3)  ;;  %v314_v11 = vld [vmem:[%s1125_s1 + $0x10] sm:$0xff] (!%p218_p3)  ;;  %vm601_vm0 = vcmask (!%p218_p3), 1043456  }
   0x9   : > { %v317_v9 = vld [vmem:[%s1126_s2] sm:$0xff] (!%p218_p3)  ;;  %v319_v12 = vld [vmem:[%s1126_s2 + $0x10] sm:$0xff] (!%p218_p3)  ;;  %v320_v13 = vld [vmem:[%s1126_s2 + $0x18] sm:$0xff] (!%p218_p3)  ;;  %v374_v15 = vshrl.u32 (!%p218_p3), %v373_v14, 7 }
   0xb   : > { %v375_v16 = vsub.s32 (!%p218_p3), 0, %v374_v15  ;;  %v379_v17 = vsub.s32 (!%p218_p3), 4, %v374_v15  ;;  %v433_v19 = vsub.s32 (!%p218_p3), 1, %v374_v15  ;;  %v437_v20 = vsub.s32 (!%p218_p3), 5, %v374_v15 }
   0xc   : > { %881 = vset.pattern.permute.xlu1 (!%p218_p3), %v939_v4  ;;  %344 = vperm.xlu0 (!%p218_p3), %879, %v321_v3   ;;  %v491_v23 = vsub.s32 (!%p218_p3), 2, %v374_v15  ;;  %v495_v24 = vsub.s32 (!%p218_p3), 6, %v374_v15  ;;  %v549_v31 = vsub.s32 (!%p218_p3), 3, %v374_v15  ;;  %v553_v32 = vsub.s32 (!%p218_p3), 7, %v374_v15 }
   0xd   : > { %486 = vperm.xlu1 (!%p218_p3), %881, %v316_v0  }
   0xe   : > { %s1135_s18 = smov (!%p272_p4, %s927_s18), 1 }
   0xf   : > { %s847_s17 = sshll.u32 %s1135_s18, 3  ;;  %s848_s25 = sshll.u32 %s1135_s18, 5 }
  0x10   : > { %882 = vset.pattern.permute.xlu0 %v940_v6  ;;  %s279_s24 = scalar_lea.vmem %s1124_s0, %s847_s17  ;;  %s289_s28 = scalar_lea.vmem %s1127_s3, %s848_s25 }
  0x11   : > { %883 = vset.pattern.permute.xlu1 %v938_v2  ;;  %544 = vperm.xlu0 %882, %v316_v0   ;;  %v311_v18 = vld [vmem:[%s279_s24] sm:$0xff]  ;;  %s299_s6 = scalar_lea.vmem %s1128_s4, %s848_s25  ;;  %s309_s9 = scalar_lea.vmem %s1129_s5, %s847_s17 }
  0x12   : > { %349 = vperm.xlu1 %883, %v312_v5   ;;  %v376_v21 = vrot.slane %v311_v18, %v375_v16  ;;  %v380_v22 = vrot.slane %v311_v18, %v379_v17  ;;  %v434_v25 = vrot.slane %v311_v18, %v433_v19  ;;  %v438_v26 = vrot.slane %v311_v18, %v437_v20 }
  0x13   : > { %v492_v29 = vrot.slane %v311_v18, %v491_v23  ;;  %v496_v30 = vrot.slane %v311_v18, %v495_v24  ;;  %v550_v41 = vrot.slane %v311_v18, %v549_v31  ;;  %v554_v42 = vrot.slane %v311_v18, %v553_v32 }
  0x14   : > { %v1031_v27 = vrot.slane %v376_v21, %v375_v16  ;;  %v1033_v28 = vrot.slane %v380_v22, %v375_v16  ;;  %v1035_v35 = vrot.slane %v434_v25, %v433_v19  ;;  %v1037_v36 = vrot.slane %v438_v26, %v433_v19 }
  0x15   : > { %885 = vset.pattern.permute.xlu0 %v937_v1  ;;  %v1041_v39 = vrot.slane %v492_v29, %v491_v23  ;;  %v1043_v40 = vrot.slane %v496_v30, %v491_v23  ;;  %v1049_v51 = vrot.slane %v550_v41, %v549_v31  ;;  %v1051_v52 = vrot.slane %v554_v42, %v549_v31 }
  0x16   : > { %416 = vperm.xlu0 %885, %v313_v7   ;;  %354 = vperm.xlu1 %883, %v313_v7  }
  0x1a   : > { %887 = vset.pattern.permute.xlu0 %v940_v6  ;;  %329 = vperm.xlu1 %883, %v318_v8  }
  0x1b   : > { %528 = vperm.xlu0 %887, %v312_v5  }
  0x1e   : > { %884 = vset.pattern.permute.xlu1 %v937_v1 }
  0x1f   : > { %888 = vset.pattern.permute.xlu0 %v938_v2  ;;  %412 = vperm.xlu1 %884, %v312_v5  }
  0x20   : > { %324 = vperm.xlu0 %888, %v317_v9  }
  0x23   : > { %886 = vset.pattern.permute.xlu1 %v939_v4 }
  0x24   : > { %470 = vperm.xlu1 %886, %v312_v5   ;;  %364 = vperm.xlu0 %888, %v315_v10  }
  0x28   : > { %474 = vperm.xlu1 %886, %v313_v7   ;;  %891 = vset.pattern.permute.xlu0 %v937_v1 }
  0x29   : > { %420 = vperm.xlu0 %891, %v314_v11  }
  0x2c   : > { %889 = vset.pattern.permute.xlu1 %v940_v6 }
  0x2d   : > { %532 = vperm.xlu1 %889, %v313_v7   ;;  %894 = vset.pattern.permute.xlu0 %v939_v4 }
  0x2e   : > { %482 = vperm.xlu0 %894, %v315_v10  }
  0x31   : > { %890 = vset.pattern.permute.xlu1 %v938_v2 }
  0x32   : > { %359 = vperm.xlu1 %890, %v314_v11   ;;  %896 = vset.pattern.permute.xlu0 %v940_v6 }
  0x36   : > { %334 = vperm.xlu1 %890, %v319_v12  }
  0x3a   : > { %339 = vperm.xlu1 %890, %v320_v13  }
  0x3e   : > { %892 = vset.pattern.permute.xlu1 %v937_v1 }
  0x3f   : > { %424 = vperm.xlu1 %892, %v315_v10  }
  0x43   : > { %893 = vset.pattern.permute.xlu1 %v939_v4 }
  0x44   : > { %478 = vperm.xlu1 %893, %v314_v11  }
  0x48   : > { %895 = vset.pattern.permute.xlu1 %v940_v6 }
  0x49   : > { %536 = vperm.xlu1 %895, %v314_v11  }
  0x4d   : > { %540 = vperm.xlu1 %895, %v315_v10  }
  0x87   : > { %v429_v33 = vpop.permute.xlu1 %428  ;;  %v370_v34 = vpop.permute.xlu0 %369 }
  0x88   : > { %v399_v37 = vmul.f32 %v1031_v27, %v370_v34  ;;  %v400_v38 = vmul.f32 %v1033_v28, %v370_v34  ;;  %v457_v44 = vmul.f32 %v1035_v35, %v429_v33  ;;  %v458_v45 = vmul.f32 %v1037_v36, %v429_v33 }
  0x8b   : > { %v345_v43 = vpop.permute.xlu0 %344 }
  0x8c   : > { %v409_v46 = vadd.f32 %v399_v37, %v345_v43  ;;  %v410_v47 = vadd.f32 %v400_v38, %v345_v43  ;;  %v487_v48 = vpop.permute.xlu1 %486 }
  0x8d   : > { %v515_v49 = vmul.f32 %v1041_v39, %v487_v48  ;;  %v516_v50 = vmul.f32 %v1043_v40, %v487_v48 }
  0x8e   : > { %v467_v53 = vadd.f32 %v457_v44, %v409_v46  ;;  %v468_v54 = vadd.f32 %v458_v45, %v410_v47 }
  0x90   : > { %v525_v55 = vadd.f32 %v515_v49, %v467_v53  ;;  %v526_v56 = vadd.f32 %v516_v50, %v468_v54  ;;  %v545_v57 = vpop.permute.xlu0 %544 }
  0x91   : > { %v573_v58 = vmul.f32 %v1049_v51, %v545_v57  ;;  %v574_v59 = vmul.f32 %v1051_v52, %v545_v57  ;;  %v350_v60 = vpop.permute.xlu1 %349 }
  0x92   : > { %v391_v15 = vmul.f32 %v1031_v27, %v350_v60  ;;  %v392_v16 = vmul.f32 %v1033_v28, %v350_v60 }
  0x93   : > { %v583_v61 = vadd.f32 %v573_v58, %v525_v55  ;;  %v584_v62 = vadd.f32 %v574_v59, %v526_v56 }
  0x95   : > { %v602_v63 = vsel %vm601_vm0, %v583_v61, -inf  ;;  %v609_v0 = vsel %vm601_vm0, %v584_v62, -inf  ;;  %v355_v1 = vpop.permute.xlu1 %354  ;;  %v417_v2 = vpop.permute.xlu0 %416 }
  0x96   : > { %v603_v3 = vrot.slane %v602_v63, 4  ;;  %v610_v4 = vrot.slane %v609_v0, 4  ;;  %v393_v29 = vmul.f32 %v1031_v27, %v355_v1  ;;  %v394_v43 = vmul.f32 %v1033_v28, %v355_v1 }
  0x97   : > { %v451_v44 = vmul.f32 %v1035_v35, %v417_v2  ;;  %v452_v48 = vmul.f32 %v1037_v36, %v417_v2 }
  0x98   : > { %v604_v5 = vmax.f32 %v602_v63, %v603_v3  ;;  %v611_v6 = vmax.f32 %v609_v0, %v610_v4 }
  0x99   : > { %v330_v7 = vpop.permute.xlu1 %329 }
  0x9a   : > { %v605_v8 = vrot.slane %v604_v5, 2  ;;  %v612_v9 = vrot.slane %v611_v6, 2  ;;  %v529_v10 = vpop.permute.xlu0 %528  ;;  %v403_v45 = vadd.f32 %v393_v29, %v330_v7  ;;  %v404_v49 = vadd.f32 %v394_v43, %v330_v7 }
  0x9b   : > { %v565_v30 = vmul.f32 %v1049_v51, %v529_v10  ;;  %v566_v31 = vmul.f32 %v1051_v52, %v529_v10 }
  0x9c   : > { %v606_v11 = vmax.f32 %v604_v5, %v605_v8  ;;  %v613_v12 = vmax.f32 %v611_v6, %v612_v9  ;;  %v461_v57 = vadd.f32 %v451_v44, %v403_v45  ;;  %v462_v60 = vadd.f32 %v452_v48, %v404_v49 }
  0x9e   : > { %v607_v13 = vrot.slane %v606_v11, 1  ;;  %v614_v14 = vrot.slane %v613_v12, 1  ;;  %v413_v17 = vpop.permute.xlu1 %412 }
  0x9f   : > { %v449_v18 = vmul.f32 %v1035_v35, %v413_v17  ;;  %v450_v19 = vmul.f32 %v1037_v36, %v413_v17  ;;  %v325_v20 = vpop.permute.xlu0 %324 }
  0xa0   : > { %v608_v21 = vmax.f32 %v606_v11, %v607_v13  ;;  %v615_v22 = vmax.f32 %v613_v12, %v614_v14  ;;  %v401_v23 = vadd.f32 %v391_v15, %v325_v20  ;;  %v402_v24 = vadd.f32 %v392_v16, %v325_v20 }
  0xa2   : > { %v616_v25 = vsub.f32 %v583_v61, %v608_v21  ;;  %v617_v26 = vsub.f32 %v584_v62, %v615_v22  ;;  %v459_v32 = vadd.f32 %v449_v18, %v401_v23  ;;  %v460_v33 = vadd.f32 %v450_v19, %v402_v24 }
  0xa3   : > { %v471_v34 = vpop.permute.xlu1 %470  ;;  %v365_v22 = vpop.permute.xlu0 %364 }
  0xa4   : > { %v618_v37 = vmul.f32 1.442695, %v616_v25  ;;  %v620_v38 = vmul.f32 1.442695, %v617_v26  ;;  %v507_v41 = vmul.f32 %v1041_v39, %v471_v34  ;;  %v508_v42 = vmul.f32 %v1043_v40, %v471_v34 }
  0xa6   : > { %897 = vpow2.f32 %v618_v37  ;;  %v517_v46 = vadd.f32 %v507_v41, %v459_v32  ;;  %v518_v47 = vadd.f32 %v508_v42, %v460_v33  ;;  %v398_v41 = vmul.f32 %v1033_v28, %v365_v22 }
  0xa7   : > { %899 = vpow2.f32 %v620_v38  ;;  %v475_v50 = vpop.permute.xlu1 %474  ;;  %v397_v38 = vmul.f32 %v1031_v27, %v365_v22 }
  0xa8   : > { %v575_v53 = vadd.f32 %v565_v30, %v517_v46  ;;  %v576_v54 = vadd.f32 %v566_v31, %v518_v47  ;;  %v509_v55 = vmul.f32 %v1041_v39, %v475_v50  ;;  %v510_v56 = vmul.f32 %v1043_v40, %v475_v50  ;;  %v421_v33 = vpop.permute.xlu0 %420 }
  0xa9   : > { %v453_v42 = vmul.f32 %v1035_v35, %v421_v33  ;;  %v454_v44 = vmul.f32 %v1037_v36, %v421_v33 }
  0xaa   : > { %v585_v58 = vmul.f32 1.442695, %v575_v53  ;;  %v587_v59 = vmul.f32 1.442695, %v576_v54  ;;  %v519_v61 = vadd.f32 %v509_v55, %v461_v57  ;;  %v520_v63 = vadd.f32 %v510_v56, %v462_v60 }
  0xac   : > { %901 = vpow2.f32 %v585_v58  ;;  %v533_v62 = vpop.permute.xlu1 %532 }
  0xad   : > { %903 = vpow2.f32 %v587_v59  ;;  %v567_v0 = vmul.f32 %v1049_v51, %v533_v62  ;;  %v568_v1 = vmul.f32 %v1051_v52, %v533_v62  ;;  %v483_v49 = vpop.permute.xlu0 %482 }
  0xae   : > { %v513_v56 = vmul.f32 %v1041_v39, %v483_v49 }
  0xaf   : > { %v577_v2 = vadd.f32 %v567_v0, %v519_v61  ;;  %v578_v3 = vadd.f32 %v568_v1, %v520_v63 }
  0xb0   : > { %v1073_v4 = vpop.eup %897 }
  0xb1   : > { %v1075_v5 = vpop.eup %899  ;;  %v622_v6 = vsel %vm601_vm0, %v1073_v4, 0.0  ;;  %v589_v7 = vmul.f32 1.442695, %v577_v2  ;;  %v591_v8 = vmul.f32 1.442695, %v578_v3  ;;  %v360_v9 = vpop.permute.xlu1 %359 }
  0xb2   : > { %v623_v10 = vrot.slane %v622_v6, 4  ;;  %v629_v11 = vsel %vm601_vm0, %v1075_v5, 0.0  ;;  %v395_v34 = vmul.f32 %v1031_v27, %v360_v9  ;;  %v396_v37 = vmul.f32 %v1033_v28, %v360_v9 }
  0xb3   : > { %v630_v12 = vrot.slane %v629_v11, 4  ;;  %905 = vpow2.f32 %v589_v7 }
  0xb4   : > { %v624_v13 = vadd.f32 %v623_v10, %v622_v6  ;;  %907 = vpow2.f32 %v591_v8 }
  0xb5   : > { %v631_v14 = vadd.f32 %v630_v12, %v629_v11  ;;  %v335_v15 = vpop.permute.xlu1 %334 }
  0xb6   : > { %v902_v16 = vpop.eup %901  ;;  %v625_v17 = vrot.slane %v624_v13, 2  ;;  %v405_v43 = vadd.f32 %v395_v34, %v335_v15  ;;  %v406_v45 = vadd.f32 %v396_v37, %v335_v15 }
  0xb7   : > { %v904_v18 = vpop.eup %903  ;;  %v632_v19 = vrot.slane %v631_v14, 2  ;;  %593 = vst [vmem:[%s289_s28] sm:$0xff] %v902_v16 }
  0xb8   : > { %v626_v20 = vadd.f32 %v625_v17, %v624_v13  ;;  %594 = vst [vmem:[%s289_s28 + $0x8] sm:$0xff] %v904_v18  ;;  %v463_v54 = vadd.f32 %v453_v42, %v405_v43  ;;  %v464_v55 = vadd.f32 %v454_v44, %v406_v45 }
  0xb9   : > { %v633_v21 = vadd.f32 %v632_v19, %v631_v14  ;;  %v340_v23 = vpop.permute.xlu1 %339 }
  0xba   : > { %v627_v24 = vrot.slane %v626_v20, 1  ;;  %v407_v27 = vadd.f32 %v397_v38, %v340_v23  ;;  %v408_v28 = vadd.f32 %v398_v41, %v340_v23 }
  0xbb   : > { %v634_v25 = vrot.slane %v633_v21, 1 }
  0xbc   : > { %v628_v26 = vadd.f32 %v627_v24, %v626_v20 }
  0xbd   : > { %v906_v29 = vpop.eup %905  ;;  %v635_v30 = vadd.f32 %v634_v25, %v633_v21 }
  0xbe   : > { %v908_v31 = vpop.eup %907  ;;  %909 = vrcp.f32 %v628_v26  ;;  %v425_v32 = vpop.permute.xlu1 %424  ;;  %595 = vst [vmem:[%s289_s28 + $0x10] sm:$0xff] %v906_v29 }
  0xbf   : > { %911 = vrcp.f32 %v635_v30  ;;  %596 = vst [vmem:[%s289_s28 + $0x18] sm:$0xff] %v908_v31  ;;  %v455_v47 = vmul.f32 %v1035_v35, %v425_v32  ;;  %v456_v48 = vmul.f32 %v1037_v36, %v425_v32  ;;  %v514_v35 = vmul.f32 %v1043_v40, %v483_v49 }
  0xc1   : > { %v465_v58 = vadd.f32 %v455_v47, %v407_v27  ;;  %v466_v59 = vadd.f32 %v456_v48, %v408_v28 }
  0xc3   : > { %v479_v46 = vpop.permute.xlu1 %478  ;;  %v523_v6 = vadd.f32 %v513_v56, %v465_v58  ;;  %v524_v7 = vadd.f32 %v514_v35, %v466_v59 }
  0xc4   : > { %v511_v50 = vmul.f32 %v1041_v39, %v479_v46  ;;  %v512_v53 = vmul.f32 %v1043_v40, %v479_v46 }
  0xc6   : > { %v521_v60 = vadd.f32 %v511_v50, %v463_v54  ;;  %v522_v63 = vadd.f32 %v512_v53, %v464_v55 }
  0xc8   : > { %v910_v57 = vpop.eup %909  ;;  %v537_v36 = vpop.permute.xlu1 %536 }
  0xc9   : > { %v912_v61 = vpop.eup %911  ;;  %v638_v62 = vmul.f32 %v910_v57, %v1073_v4  ;;  %v569_v0 = vmul.f32 %v1049_v51, %v537_v36  ;;  %v570_v1 = vmul.f32 %v1051_v52, %v537_v36 }
  0xca   : > { %v639_v2 = vmul.f32 %v912_v61, %v1075_v5 }
  0xcb   : > { %v579_v39 = vadd.f32 %v569_v0, %v521_v60  ;;  %v580_v40 = vadd.f32 %v570_v1, %v522_v63 }
  0xcc   : > { %v642_v3 = vcombine.low %v638_v62, %v639_v2  ;;  %v541_v4 = vpop.permute.xlu1 %540 }
  0xcd   : > { %597 = vst [vmem:[%s299_s6] sm:$0xff] %v579_v39  ;;  %598 = vst [vmem:[%s299_s6 + $0x8] sm:$0xff] %v580_v40  ;;  %v571_v5 = vmul.f32 %v1049_v51, %v541_v4  ;;  %v572_v8 = vmul.f32 %v1051_v52, %v541_v4 }
  0xce   : > { %644 = vst [vmem:[%s309_s9] sm:$0xff] %v642_v3 }
  0xcf   : > { %v581_v9 = vadd.f32 %v571_v5, %v523_v6  ;;  %v582_v10 = vadd.f32 %v572_v8, %v524_v7 }
  0xd1   : > { %599 = vst [vmem:[%s299_s6 + $0x10] sm:$0xff] %v581_v9  ;;  %600 = vst [vmem:[%s299_s6 + $0x18] sm:$0xff] %v582_v10 }
  0xd2 PF: > { %s16_s20 = sadd.s32 1, %s935_s20   ;;  %s1130_s18 = smov %s931_s19 }
  0xd3   : > { %p13_p5 = scmp.ge.s32.totalorder %s16_s20, 4   ;;  %s1131_s19 = smov %s1133_s21 }
  0xd5   :  { %15 = sbr.rel (!%p13_p5) target bundleno = 2 (0x2), region = 86 }

</bundles_post_ra>
